<compile_context>
chip_gen: v7x
topology: tpu7x:2x2x1
jax: 0.10.0
libtpu: 0.0.40
codegen_flags: <defaults>
</compile_context>

<pallas_src>
import functools

import numpy as np
import jax
import jax.numpy as jnp
from jax.experimental import pallas as pl
from jax.experimental.pallas import tpu as pltpu


# ----------------------------- kernels ------------------------------------


def _kernel_f32(buf_ref, xl_ref, out_ref):
    """f32 state: single output is both the return value and the new state."""
    B = buf_ref.shape[0]
    # Sublane left-shift by one: roll by B-1 == jnp.roll(buf, -1, axis=0); the
    # wrapped row (old row 0) lands in row B-1 and is replaced by the new sample.
    rolled = pltpu.roll(buf_ref[...], shift=B - 1, axis=0)
    row = jax.lax.broadcasted_iota(jnp.int32, rolled.shape, 0)
    newest = jnp.broadcast_to(xl_ref[...].astype(jnp.float32), rolled.shape)
    out_ref[...] = jnp.where(row == B - 1, newest, rolled)  # one unmasked store


def _kernel_bf16(buf_ref, xl_ref, out_ref, state_ref):
    """bf16 state (aliased onto the input) + f32 return value (torch rounding)."""
    B = buf_ref.shape[0]
    # Roll in f32 (exact for bf16 values); the VPU extend/truncate is free here.
    rolled = pltpu.roll(buf_ref[...].astype(jnp.float32), shift=B - 1, axis=0)
    row = jax.lax.broadcasted_iota(jnp.int32, rolled.shape, 0)
    newest_bf16 = xl_ref[...].astype(jnp.bfloat16)          # round once, torch-style
    newest = jnp.broadcast_to(newest_bf16.astype(jnp.float32), rolled.shape)
    new_f32 = jnp.where(row == B - 1, newest, rolled)
    out_ref[...] = new_f32                                   # f32 return value
    state_ref[...] = new_f32.astype(jnp.bfloat16)            # exact round trip


# --------------------------- tiling policy ---------------------------------

_VMEM_BUDGET = 12 << 20  # bytes; safe under v5e's 16 MiB default scoped VMEM


def _bytes_per_lane(B: int) -> int:
    # Double-buffered streams per lane: buf in (<=4B/row) + x in (padded to 8
    # f32 sublanes) + f32 out (+ bf16 state out on the bf16 path is bounded by
    # the same 8B total per row).
    return 2 * (8 * B + 32)


def _use_pallas(R: int, B: int) -> bool:
    if R * B <= 512:                      # pallas fixed cost dominates
        return False
    bpl = _bytes_per_lane(B)
    if R % 128 != 0:
        # Must run as a single full-extent lane block; only if it fits VMEM.
        # TODO(synk): pad R up to a multiple of 128 instead for huge ragged R.
        return R * bpl <= _VMEM_BUDGET
    return 128 * bpl <= _VMEM_BUDGET      # at least one 128-lane tile must fit


def _lane_tile(R: int, B: int) -> int:
    if R % 128 != 0:
        return R                          # full extent satisfies the (8,128) rule
    bpl = _bytes_per_lane(B)
    tl = (_VMEM_BUDGET // bpl) // 128 * 128
    tl = max(128, min(R, tl))
    # Ensure >= 2 grid steps when possible so dimension_semantics=("parallel",)
    # can shard the loop across v7x's two TensorCores (neutral on v5e/v6e).
    if tl >= R and R >= 256:
        tl = (R // 2) // 128 * 128
    return tl
    # TODO(synk): add a dedicated test for a ragged last lane-tile (R % TL != 0)
    # combined with input_output_aliases before relying on it at scale.


# --------------------------- pallas wrapper ---------------------------------


def _pallas_update(state_bt, x_last):
    """state_bt: [B, R] persistent buffer; x_last: [1, R] newest sample."""
    B, R = state_bt.shape
    TL = _lane_tile(R, B)
    grid = (pl.cdiv(R, TL),)
    buf_spec = pl.BlockSpec((B, TL), lambda i: (0, i))
    x_spec = pl.BlockSpec((1, TL), lambda i: (0, i))
    cparams = pltpu.CompilerParams(dimension_semantics=("parallel",))

    if state_bt.dtype == jnp.float32:
        out = pl.pallas_call(
            _kernel_f32,
            grid=grid,
            in_specs=[buf_spec, x_spec],
            out_specs=buf_spec,
            out_shape=jax.ShapeDtypeStruct((B, R), jnp.float32),
            input_output_aliases={0: 0},       # state updated in place
            compiler_params=cparams,
        )(state_bt, x_last)
        return out, out                        # the f32 output IS the new state

    out, state = pl.pallas_call(
        _kernel_bf16,
        grid=grid,
        in_specs=[buf_spec, x_spec],
        out_specs=(pl.BlockSpec((B, TL), lambda i: (0, i)), buf_spec),
        out_shape=(
            jax.ShapeDtypeStruct((B, R), jnp.float32),
            jax.ShapeDtypeStruct((B, R), state_bt.dtype),
        ),
        input_output_aliases={0: 1},           # bf16 state aliases the input
        compiler_params=cparams,
    )(state_bt, x_last)
    return out, state


@functools.partial(jax.jit, donate_argnums=(0,))
def _circular_buffer_step(state_bt, x):
    """state_bt: [B, R] (lane-dense, donated).  x: [*latent_dim, seq].

    Returns (out float32 [*latent_dim, B], new state [B, R])."""
    B, R = state_bt.shape
    latent = x.shape[:-1]
    if int(np.prod(latent) if latent else 1) != R:
        raise ValueError(f"x latent dims {latent} do not match buffer R={R}")

    x_last = x[..., -1].reshape(1, R)          # newest sample only, lane-dense

    if _use_pallas(R, B):
        out_bt, new_state = _pallas_update(state_bt, x_last)
    else:
        # Tiny problem: fused XLA path; pallas fixed cost is not worth it.
        new_state = jnp.concatenate(
            [state_bt[1:], x_last.astype(state_bt.dtype)], axis=0)
        out_bt = new_state.astype(jnp.float32)

    out = out_bt.T.reshape(*latent, B)         # module contract: [..., B] order
    return out, new_state


# ------------------------------ module -------------------------------------


class CircularBufferJAX:
    """Functional JAX/Pallas port of the PyTorch CircularBuffer module.

    The persistent state is kept transposed as [buffer_size, R] for TPU
    efficiency and is DONATED / updated in place each step: do not hold the
    previous `self._state` device array across forward() calls; use `peek()`
    (or the `.buffer` property) for a safe host copy in the original layout.
    """

    def __init__(self, buffer_size: int, latent_dim, bf16: bool = False):
        self.buffer_size = int(buffer_size)
        self.latent_dim = tuple(latent_dim)
        self._R = int(np.prod(self.latent_dim)) if self.latent_dim else 1
        dtype = jnp.bfloat16 if bf16 else jnp.float32
        self._state = jnp.zeros((self.buffer_size, self._R), dtype=dtype)

    def peek(self):
        """Host copy of the buffer in the original [*latent_dim, B] layout."""
        host = np.asarray(jax.device_get(self._state))       # [B, R]
        return host.T.reshape(*self.latent_dim, self.buffer_size)

    @property
    def buffer(self):
        return self.peek()

    def forward(self, x):
        out, self._state = _circular_buffer_step(self._state, x)
        return out

    __call__ = forward


# ------------------------------- demo --------------------------------------


def _np_reference_step(state_np, x_np):
    """NumPy shadow of the torch forward (state_np in buffer dtype)."""
    newest = x_np[..., -1].astype(state_np.dtype)
    new_state = np.concatenate([state_np[..., 1:], newest[..., None]], axis=-1)
    return new_state, new_state.astype(np.float32)


def _run_case(key, latent_dim, buffer_size, seq, bf16, steps, atol):
    mod = CircularBufferJAX(buffer_size, latent_dim, bf16=bf16)
    ref_dtype = jnp.bfloat16 if bf16 else np.float32
    ref_state = np.zeros((*latent_dim, buffer_size), dtype=ref_dtype)
    for _ in range(steps):
        key, sub = jax.random.split(key)
        x = jax.random.normal(sub, (*latent_dim, seq), dtype=jnp.float32)
        x_host = np.asarray(x)                       # copy before the step
        out = jax.block_until_ready(mod.forward(x))
        ref_state, ref_out = _np_reference_step(ref_state, x_host)
        assert out.shape == (*latent_dim, buffer_size)
        assert out.dtype == jnp.float32
        np.testing.assert_allclose(np.asarray(out), ref_out, atol=atol, rtol=0)
    # State round-trips through peek() in the original layout as well.
    np.testing.assert_allclose(
        mod.peek().astype(np.float32), ref_state.astype(np.float32),
        atol=atol, rtol=0)
    return key


if __name__ == "__main__":
    key = jax.random.PRNGKey(0)

    # Main case: x [2, 4, 16, 16] -> R = 128 lanes, B = 16 (Pallas, lane-dense).
    key = _run_case(key, (2, 4, 16), 16, 16, bf16=False, steps=3, atol=1e-6)

    # bf16 state path (Pallas): bf16 state aliased in place + f32 return value.
    key = _run_case(key, (2, 4, 16), 16, 16, bf16=True, steps=3, atol=1e-2)

    # Multi-tile grid: R = 512 -> two 256-lane tiles ("parallel" steps for v7x).
    key = _run_case(key, (512,), 16, 8, bf16=False, steps=2, atol=1e-6)

    # Tiny buffer (R*B = 512 elements) routed to the fused XLA fallback.
    key = _run_case(key, (4, 8), 16, 8, bf16=False, steps=2, atol=1e-6)

    print("KERNEL_OK")
</pallas_src>

<mosaic_0001>
module attributes {stable_mosaic.version = 11 : i64} {
  func.func @_kernel_f32(%arg0: i32, %arg1: memref<16x128xf32, #tpu.memory_space<vmem>>, %arg2: memref<1x128xf32, #tpu.memory_space<vmem>>, %arg3: memref<16x128xf32, #tpu.memory_space<vmem>>) attributes {dimension_semantics = [#tpu.dimension_semantics<parallel>], iteration_bounds = array<i64: 1>, scalar_prefetch = 0 : i64, scratch_operands = 0 : i64, tpu.core_type = #tpu.core_type<tc>, window_params = [{transform_indices = @transform_0, window_bounds = array<i64: 16, 128>}, {transform_indices = @transform_1, window_bounds = array<i64: 1, 128>}, {transform_indices = @transform_2, window_bounds = array<i64: 16, 128>}]} {
    %c0 = arith.constant 0 : index
    %c0_0 = arith.constant 0 : index
    %0 = vector.load %arg1[%c0, %c0_0] : memref<16x128xf32, #tpu.memory_space<vmem>>, vector<16x128xf32>
    %c15_i32 = arith.constant 15 : i32
    %1 = tpu.dynamic_rotate %0 by %c15_i32 dim 0 : vector<16x128xf32>, i32 -> vector<16x128xf32>
    %2 = tpu.iota {dimensions = array<i32: 0>} : vector<16x128xi32>
    %c0_1 = arith.constant 0 : index
    %c0_2 = arith.constant 0 : index
    %3 = vector.load %arg2[%c0_1, %c0_2] : memref<1x128xf32, #tpu.memory_space<vmem>>, vector<1x128xf32>
    %4 = vector.shape_cast %3 : vector<1x128xf32> to vector<1x128xf32>
    %5 = vector.broadcast %4 : vector<1x128xf32> to vector<16x128xf32>
    %c15_i32_3 = arith.constant 15 : i32
    %6 = vector.broadcast %c15_i32_3 : i32 to vector<16x128xi32>
    %7 = arith.cmpi eq, %2, %6 : vector<16x128xi32>
    %8 = arith.select %7, %5, %1 : vector<16x128xi1>, vector<16x128xf32>
    %c0_4 = arith.constant 0 : index
    %c0_5 = arith.constant 0 : index
    %9 = vector.load %arg3[%c0_4, %c0_5] : memref<16x128xf32, #tpu.memory_space<vmem>>, vector<16x128xf32>
    tpu.vector_store %arg3[%c0_4, %c0_5], %8 {strides = array<i32>} : memref<16x128xf32, #tpu.memory_space<vmem>>, vector<16x128xf32>,
    return
  }
  func.func @transform_0(%arg0: i32) -> (i32, i32) {
    %c0_i32 = arith.constant 0 : i32
    %c0_i32_0 = arith.constant 0 : i32
    return %c0_i32, %arg0 : i32, i32
  }
  func.func @transform_1(%arg0: i32) -> (i32, i32) {
    %c0_i32 = arith.constant 0 : i32
    %c0_i32_0 = arith.constant 0 : i32
    return %c0_i32, %arg0 : i32, i32
  }
  func.func @transform_2(%arg0: i32) -> (i32, i32) {
    %c0_i32 = arith.constant 0 : i32
    %c0_i32_0 = arith.constant 0 : i32
    return %c0_i32, %arg0 : i32, i32
  }
}

</mosaic_0001>

<bundles_post_ra>
// kernel: squeeze.1
= control target key start
LH: loop header
LB: loop body
LE: loop exit
PB: predicated region body
PF: predicated region fallthrough
CT: control target
= control target key end

     0   :  { %vm11_vm0 = vcmask 130048   ;;  %s70_s10 = smov 80   ;;  %s71_s11 = smov 96   ;;  %vm17_vm1 = vcmask 1048448   ;;  %vm23_vm2 = vcmask 917248   ;;  %vm29_vm3 = vcmask 786048   ;;  %s95_s0 = inlined_call_operand.vmem [shape: f32[2,4,16], index: 0, kind: input, shape index: {}]   ;;  %s96_s1 = inlined_call_operand.vmem [shape: f32[1,128], index: 1, kind: output, shape index: {}]  }
   0x1   :  { %v61_v0 = vld [vmem:[%s95_s0 + $0x4] sm:$0xf]  ;;  %v8_v1 = vld [vmem:[%s95_s0] sm:$0xf]  ;;  %s69_s0 = smov 112   ;;  %s72_s12 = smov 64  }
   0x2   :  { %7 = vst [vmem:[#allocation1 + $0x8] sm:$0xf] %v61_v0  ;;  %9 = vst [vmem:[#allocation1] sm:$0xf] %v8_v1  ;;  %s73_s13 = smov 48   ;;  %s74_s14 = smov 32  }
   0x3   :  { %s75_s15 = smov 16   ;;  %vm35_vm4 = vcmask 654848   ;;  %vm41_vm5 = vcmask 523648   ;;  %vm47_vm6 = vcmask 392448   ;;  %vm53_vm7 = vcmask 261248  }
   0x9   :  { %v14_v2 = vld [vmem:[#allocation1 + $0xb] sm:$0x1]   ;;  %v26_v3 = vld [vmem:[#allocation1 + $0x9] sm:$0x1]   ;;  %v20_v4 = vld [vmem:[#allocation1 + $0xa] sm:$0x1]  }
   0xa   :  { %15 = vrot.lane.b32.xlu0 %v14_v2, %s69_s0  ;;  %27 = vrot.lane.b32.xlu1 %v26_v3, %s70_s10  ;;  %v32_v5 = vld [vmem:[#allocation1 + $0x8] sm:$0x1]   ;;  %v10_v6 = vld [vmem:[#allocation1] sm:$0x1]   ;;  %v38_v7 = vld [vmem:[#allocation1 + $0x3] sm:$0x1]  }
   0xb   :  { %12 = vst.msk [vmem:[#allocation0] sm:$0x1] %vm11_vm0, %v10_v6   ;;  %v44_v8 = vld [vmem:[#allocation1 + $0x2] sm:$0x1]   ;;  %v50_v9 = vld [vmem:[#allocation1 + $0x1] sm:$0x1]  }
   0xe   :  { %21 = vrot.lane.b32.xlu0 %v20_v4, %s71_s11  ;;  %33 = vrot.lane.b32.xlu1 %v32_v5, %s72_s12 }
  0x12   :  { %39 = vrot.lane.b32.xlu0 %v38_v7, %s73_s13  ;;  %45 = vrot.lane.b32.xlu1 %v44_v8, %s74_s14 }
  0x16   :  { %51 = vrot.lane.b32.xlu0 %v50_v9, %s75_s15 }
  0x7c   :  { %v16_v10 = vpop.permute.xlu0 %15   ;;  %v28_v11 = vpop.permute.xlu1 %27  }
  0x7d   :  { %18 = vst.msk [vmem:[#allocation0] sm:$0x1] %vm17_vm1, %v16_v10  }
  0x80   :  { %v22_v12 = vpop.permute.xlu0 %21   ;;  %v34_v13 = vpop.permute.xlu1 %33  }
  0x81   :  { %24 = vst.msk [vmem:[#allocation0] sm:$0x1] %vm23_vm2, %v22_v12  }
  0x82   :  { %30 = vst.msk [vmem:[#allocation0] sm:$0x1] %vm29_vm3, %v28_v11  }
  0x83   :  { %36 = vst.msk [vmem:[#allocation0] sm:$0x1] %vm35_vm4, %v34_v13  }
  0x84   :  { %v40_v14 = vpop.permute.xlu0 %39   ;;  %v46_v15 = vpop.permute.xlu1 %45  }
  0x85   :  { %42 = vst.msk [vmem:[#allocation0] sm:$0x1] %vm41_vm5, %v40_v14  }
  0x86   :  { %48 = vst.msk [vmem:[#allocation0] sm:$0x1] %vm47_vm6, %v46_v15  }
  0x88   :  { %v52_v16 = vpop.permute.xlu0 %51  }
  0x89   :  { %54 = vst.msk [vmem:[#allocation0] sm:$0x1] %vm53_vm7, %v52_v16  }
  0x90   :  { %v58_v17 = vld [vmem:[#allocation0] sm:$0x1] }
  0x91   :  { %60 = vst [vmem:[%s96_s1] sm:$0x1] %v58_v17 }

// kernel: _circular_buffer_step.1
= control target key start
LH: loop header
LB: loop body
LE: loop exit
PB: predicated region body
PF: predicated region fallthrough
CT: control target
= control target key end

     0   :  { %v15_v0 = vlaneseq  ;;  %s69_s0 = inlined_call_operand.vmem [shape: f32[16,128], index: 0, kind: input, shape index: {}, may-alias: {0,2}]   ;;  %s70_s1 = inlined_call_operand.vmem [shape: f32[1,128], index: 1, kind: input, shape index: {}]   ;;  %s71_s2 = inlined_call_operand.vmem [shape: f32[16,128], index: 2, kind: output, shape index: {}, may-alias: {0,2}]  }
   0x1   :  { %v11_v1 = vld [vmem:[%s69_s0] sm:$0xff]  ;;  %v12_v2 = vld [vmem:[%s69_s0 + $0x8] sm:$0xff] }
   0x2   :  { %v13_v3 = vrot.slane %v11_v1, 1  ;;  %v14_v4 = vrot.slane %v12_v2, 1  ;;  %v16_v5 = vshrl.u32 %v15_v0, 7  ;;  %v38_v7 = vld [vmem:[%s70_s1] ss:$0 sm:$0xff] }
   0x4   :  { %vm17_vm0 = vcmp.lt.s32.totalorder %v16_v5, 7  ;;  %v20_v6 = vadd.s32 8, %v16_v5 }
   0x5   :  { %v18_v8 = vsel %vm17_vm0, %v13_v3, %v14_v4  ;;  %v19_v9 = vsel %vm17_vm0, %v14_v4, %v13_v3 }
   0x6   :  { %32 = vst [vmem:[%s71_s2] sm:$0xff] %v18_v8  ;;  %vm29_vm1 = vcmp.eq.s32.totalorder %v20_v6, 15 }
   0x7   :  { %v31_v10 = vsel %vm29_vm1, %v38_v7, %v19_v9 }
   0x8   :  { %33 = vst [vmem:[%s71_s2 + $0x8] sm:$0xff] %v31_v10 }

</bundles_post_ra>
